<compile_context>
chip_gen: v6e
topology: v6e:2x2x1
jax: 0.10.0
libtpu: 0.0.40
codegen_flags: <defaults>
</compile_context>

<pallas_src>
import functools

import jax
import jax.numpy as jnp
from jax import lax
from jax.experimental import pallas as pl
from jax.experimental.pallas import tpu as pltpu

# Explicit VMEM limit (review feedback): safe on v5e/v6e/v7x; blocks here are tiny.
_VMEM_LIMIT = 32 * 1024 * 1024


def _power_iter_kernel(w_ref, u_ref, u_out, v_out, sigma_out, *, eps,
                       power_iterations):
    """Power iteration + sigma on the full (H, Wd) weight held in VMEM."""
    w = w_ref[...].astype(jnp.float32)          # (H, Wd)
    u = u_ref[...].astype(jnp.float32)          # (1, H)
    v = None
    wv = None
    for _ in range(power_iterations):           # static unroll (default 1)
        # v = l2normalize(w^T u)
        wtu = jnp.dot(u, w, preferred_element_type=jnp.float32)          # (1, Wd)
        inv_n = pl.reciprocal(
            jnp.sqrt(jnp.sum(wtu * wtu, keepdims=True)) + eps, approx=False)
        v = wtu * inv_n
        # u = l2normalize(w v)
        wv = lax.dot_general(v, w, (((1,), (1,)), ((), ())),
                             preferred_element_type=jnp.float32)         # (1, H)
        inv_n = pl.reciprocal(
            jnp.sqrt(jnp.sum(wv * wv, keepdims=True)) + eps, approx=False)
        u = wv * inv_n
    # sigma = u . (w v); wv already holds w @ v for the final v.
    sigma_out[...] = jnp.sum(u * wv, keepdims=True)                      # (1, 1)
    u_out[...] = u
    v_out[...] = v


def _sn_linear_kernel(x_ref, w_ref, sigma_ref, b_ref, y_ref):
    """y = x @ (w / sigma)^T + b, computed as (x @ w^T) * (1/sigma) + b."""
    x = x_ref[...].astype(jnp.float32)          # (blk_b, Wd)
    w = w_ref[...].astype(jnp.float32)          # (H, Wd), resident across grid
    inv_sigma = pl.reciprocal(sigma_ref[...], approx=False)   # (1, 1)
    xwT = lax.dot_general(x, w, (((1,), (1,)), ((), ())),
                          preferred_element_type=jnp.float32)  # (blk_b, H)
    y = xwT * inv_sigma + b_ref[...].astype(jnp.float32)
    y_ref[...] = y.astype(y_ref.dtype)


def spectral_norm_linear(x, w_bar, u, bias, *, eps=1e-12, power_iterations=1):
    """SpectralNorm(nn.Linear) forward.

    x: (B, Wd), w_bar: (H, Wd), u: (H,), bias: (H,)
    Returns (y, u_new, v_new, sigma)."""
    assert power_iterations >= 1
    H, Wd = w_bar.shape
    B, Wd_x = x.shape
    assert Wd_x == Wd

    u2 = u.reshape(1, H).astype(jnp.float32)

    u_new, v_new, sigma = pl.pallas_call(
        functools.partial(_power_iter_kernel, eps=float(eps),
                          power_iterations=int(power_iterations)),
        out_shape=(jax.ShapeDtypeStruct((1, H), jnp.float32),
                   jax.ShapeDtypeStruct((1, Wd), jnp.float32),
                   jax.ShapeDtypeStruct((1, 1), jnp.float32)),
        grid_spec=pltpu.PrefetchScalarGridSpec(
            num_scalar_prefetch=0,
            grid=(1,),
            in_specs=[pl.BlockSpec((H, Wd), lambda i: (0, 0)),
                      pl.BlockSpec((1, H), lambda i: (0, 0))],
            out_specs=(pl.BlockSpec((1, H), lambda i: (0, 0)),
                       pl.BlockSpec((1, Wd), lambda i: (0, 0)),
                       pl.BlockSpec((1, 1), lambda i: (0, 0)))),
        compiler_params=pltpu.CompilerParams(
            dimension_semantics=("arbitrary",),
            vmem_limit_bytes=_VMEM_LIMIT),
    )(w_bar, u2)

    # Linear forward with the spectrally-normalized weight.
    blk_b = B if B <= 512 else 512            # large batch blocks per grid step
    grid_b = pl.cdiv(B, blk_b)
    b2 = bias.reshape(1, H)

    y = pl.pallas_call(
        _sn_linear_kernel,
        out_shape=jax.ShapeDtypeStruct((B, H), x.dtype),
        grid_spec=pltpu.PrefetchScalarGridSpec(
            num_scalar_prefetch=0,
            grid=(grid_b,),
            in_specs=[pl.BlockSpec((blk_b, Wd), lambda i: (i, 0)),
                      pl.BlockSpec((H, Wd), lambda i: (0, 0)),
                      pl.BlockSpec((1, 1), lambda i: (0, 0)),
                      pl.BlockSpec((1, H), lambda i: (0, 0))],
            out_specs=pl.BlockSpec((blk_b, H), lambda i: (i, 0))),
        compiler_params=pltpu.CompilerParams(
            dimension_semantics=("parallel",),
            vmem_limit_bytes=_VMEM_LIMIT),
    )(x, w_bar, sigma, b2)

    return y, u_new.reshape(H), v_new.reshape(Wd), sigma.reshape(())


def _reference(x, w_bar, u0, bias, eps=1e-12, power_iterations=1):
    """Pure-JAX reference mirroring the PyTorch SpectralNorm + Linear forward."""
    w = w_bar.astype(jnp.float32)
    u = u0.astype(jnp.float32)
    v = None
    for _ in range(power_iterations):
        v = w.T @ u
        v = v / (jnp.linalg.norm(v) + eps)
        wv = w @ v
        u = wv / (jnp.linalg.norm(wv) + eps)
    sigma = jnp.dot(u, w @ v)
    y = x @ (w / sigma).T + bias
    return y, u, v, sigma


if __name__ == "__main__":
    key = jax.random.PRNGKey(0)
    kx, kw, ku, kb = jax.random.split(key, 4)

    # Wrapped module: nn.Linear(in_features=128, out_features=32), batch=8.
    # (in_features chosen as a multiple of 128 for lane-dense blocks.)
    B, IN, OUT = 8, 128, 32
    x = jax.random.normal(kx, (B, IN), dtype=jnp.float32)
    w_bar = jax.random.normal(kw, (OUT, IN), dtype=jnp.float32) * 0.1
    bias = jax.random.normal(kb, (OUT,), dtype=jnp.float32) * 0.1
    # u buffer: normal(0, 1) then l2-normalized, as in _make_params().
    u0 = jax.random.normal(ku, (OUT,), dtype=jnp.float32)
    u0 = u0 / (jnp.linalg.norm(u0) + 1e-12)

    y, u_new, v_new, sigma = spectral_norm_linear(x, w_bar, u0, bias,
                                                  eps=1e-12,
                                                  power_iterations=1)
    y = jax.block_until_ready(y)

    y_ref, u_ref, v_ref, sigma_ref = _reference(x, w_bar, u0, bias,
                                                eps=1e-12, power_iterations=1)
    assert jnp.allclose(sigma, sigma_ref, atol=1e-5, rtol=1e-5), "sigma mismatch"
    assert jnp.allclose(u_new, u_ref, atol=1e-5, rtol=1e-5), "u mismatch"
    assert jnp.allclose(v_new, v_ref, atol=1e-5, rtol=1e-5), "v mismatch"
    assert jnp.allclose(y, y_ref, atol=1e-4, rtol=1e-4), "output mismatch"

    print("KERNEL_OK")
</pallas_src>

<mosaic_0001>
module attributes {stable_mosaic.version = 11 : i64} {
  func.func @_power_iter_kernel(%arg0: i32, %arg1: memref<32x128xf32, #tpu.memory_space<vmem>>, %arg2: memref<1x32xf32, #tpu.memory_space<vmem>>, %arg3: memref<1x32xf32, #tpu.memory_space<vmem>>, %arg4: memref<1x128xf32, #tpu.memory_space<vmem>>, %arg5: memref<1x1xf32, #tpu.memory_space<vmem>>) attributes {dimension_semantics = [#tpu.dimension_semantics<arbitrary>], iteration_bounds = array<i64: 1>, scalar_prefetch = 0 : i64, scratch_operands = 0 : i64, tpu.core_type = #tpu.core_type<tc>, window_params = [{pipeline_mode = #tpu.pipeline_mode<synchronous>, transform_indices = @transform_0, window_bounds = array<i64: 32, 128>}, {pipeline_mode = #tpu.pipeline_mode<synchronous>, transform_indices = @transform_1, window_bounds = array<i64: 1, 32>}, {pipeline_mode = #tpu.pipeline_mode<synchronous>, transform_indices = @transform_2, window_bounds = array<i64: 1, 32>}, {pipeline_mode = #tpu.pipeline_mode<synchronous>, transform_indices = @transform_3, window_bounds = array<i64: 1, 128>}, {pipeline_mode = #tpu.pipeline_mode<synchronous>, transform_indices = @transform_4, window_bounds = array<i64: 1, 1>}]} {
    %c0 = arith.constant 0 : index
    %c0_0 = arith.constant 0 : index
    %0 = vector.load %arg1[%c0, %c0_0] : memref<32x128xf32, #tpu.memory_space<vmem>>, vector<32x128xf32>
    %c0_1 = arith.constant 0 : index
    %c0_2 = arith.constant 0 : index
    %1 = vector.load %arg2[%c0_1, %c0_2] : memref<1x32xf32, #tpu.memory_space<vmem>>, vector<1x32xf32>
    %cst = arith.constant dense<0.000000e+00> : vector<1x128xf32>
    %2 = tpu.matmul %1, %0, %cst {dimension_numbers = #tpu.dot_dimension_numbers<[1], [0], [0], [1], [0, 0, 1, 1], [], []>} : vector<1x32xf32>, vector<32x128xf32>, vector<1x128xf32> -> vector<1x128xf32>
    %3 = arith.mulf %2, %2 : vector<1x128xf32>
    %4 = vector.shape_cast %3 : vector<1x128xf32> to vector<1x1x128xf32>
    %cst_3 = arith.constant dense<0.000000e+00> : vector<1xf32>
    %5 = vector.multi_reduction <add>, %4, %cst_3 [1, 2] : vector<1x1x128xf32> to vector<1xf32>
    %6 = vector.shape_cast %5 : vector<1xf32> to vector<1x1x1xf32>
    %7 = vector.extract %6[0, 0, 0] : f32 from vector<1x1x1xf32>
    %8 = vector.broadcast %7 : f32 to vector<1x1xf32>
    %9 = math.sqrt %8 : vector<1x1xf32>
    %cst_4 = arith.constant 9.99999996E-13 : f32
    %10 = vector.broadcast %cst_4 : f32 to vector<1x1xf32>
    %11 = arith.addf %9, %10 : vector<1x1xf32>
    %12 = tpu.reciprocal %11 : vector<1x1xf32> -> vector<1x1xf32>
    %13 = vector.broadcast %12 : vector<1x1xf32> to vector<1x128xf32>
    %14 = arith.mulf %2, %13 : vector<1x128xf32>
    %cst_5 = arith.constant dense<0.000000e+00> : vector<1x32xf32>
    %15 = tpu.matmul %14, %0, %cst_5 {dimension_numbers = #tpu.dot_dimension_numbers<[1], [1], [0], [0], [0, 0, 1, 0], [], []>} : vector<1x128xf32>, vector<32x128xf32>, vector<1x32xf32> -> vector<1x32xf32>
    %16 = arith.mulf %15, %15 : vector<1x32xf32>
    %17 = vector.shape_cast %16 : vector<1x32xf32> to vector<1x1x32xf32>
    %cst_6 = arith.constant dense<0.000000e+00> : vector<1xf32>
    %18 = vector.multi_reduction <add>, %17, %cst_6 [1, 2] : vector<1x1x32xf32> to vector<1xf32>
    %19 = vector.shape_cast %18 : vector<1xf32> to vector<1x1x1xf32>
    %20 = vector.extract %19[0, 0, 0] : f32 from vector<1x1x1xf32>
    %21 = vector.broadcast %20 : f32 to vector<1x1xf32>
    %22 = math.sqrt %21 : vector<1x1xf32>
    %cst_7 = arith.constant 9.99999996E-13 : f32
    %23 = vector.broadcast %cst_7 : f32 to vector<1x1xf32>
    %24 = arith.addf %22, %23 : vector<1x1xf32>
    %25 = tpu.reciprocal %24 : vector<1x1xf32> -> vector<1x1xf32>
    %26 = vector.broadcast %25 : vector<1x1xf32> to vector<1x32xf32>
    %27 = arith.mulf %15, %26 : vector<1x32xf32>
    %28 = arith.mulf %27, %15 : vector<1x32xf32>
    %29 = vector.shape_cast %28 : vector<1x32xf32> to vector<1x1x32xf32>
    %cst_8 = arith.constant dense<0.000000e+00> : vector<1xf32>
    %30 = vector.multi_reduction <add>, %29, %cst_8 [1, 2] : vector<1x1x32xf32> to vector<1xf32>
    %31 = vector.shape_cast %30 : vector<1xf32> to vector<1x1x1xf32>
    %32 = vector.extract %31[0, 0, 0] : f32 from vector<1x1x1xf32>
    %33 = vector.broadcast %32 : f32 to vector<1x1xf32>
    %c0_9 = arith.constant 0 : index
    %c0_10 = arith.constant 0 : index
    %34 = vector.load %arg5[%c0_9, %c0_10] : memref<1x1xf32, #tpu.memory_space<vmem>>, vector<1x1xf32>
    tpu.vector_store %arg5[%c0_9, %c0_10], %33 {strides = array<i32>} : memref<1x1xf32, #tpu.memory_space<vmem>>, vector<1x1xf32>,
    %c0_11 = arith.constant 0 : index
    %c0_12 = arith.constant 0 : index
    %35 = vector.load %arg3[%c0_11, %c0_12] : memref<1x32xf32, #tpu.memory_space<vmem>>, vector<1x32xf32>
    tpu.vector_store %arg3[%c0_11, %c0_12], %27 {strides = array<i32>} : memref<1x32xf32, #tpu.memory_space<vmem>>, vector<1x32xf32>,
    %c0_13 = arith.constant 0 : index
    %c0_14 = arith.constant 0 : index
    %36 = vector.load %arg4[%c0_13, %c0_14] : memref<1x128xf32, #tpu.memory_space<vmem>>, vector<1x128xf32>
    tpu.vector_store %arg4[%c0_13, %c0_14], %14 {strides = array<i32>} : memref<1x128xf32, #tpu.memory_space<vmem>>, vector<1x128xf32>,
    return
  }
  func.func @transform_0(%arg0: i32) -> (i32, i32) {
    %c0_i32 = arith.constant 0 : i32
    %c0_i32_0 = arith.constant 0 : i32
    %c0_i32_1 = arith.constant 0 : i32
    return %c0_i32, %c0_i32_0 : i32, i32
  }
  func.func @transform_1(%arg0: i32) -> (i32, i32) {
    %c0_i32 = arith.constant 0 : i32
    %c0_i32_0 = arith.constant 0 : i32
    %c0_i32_1 = arith.constant 0 : i32
    return %c0_i32, %c0_i32_0 : i32, i32
  }
  func.func @transform_2(%arg0: i32) -> (i32, i32) {
    %c0_i32 = arith.constant 0 : i32
    %c0_i32_0 = arith.constant 0 : i32
    %c0_i32_1 = arith.constant 0 : i32
    return %c0_i32, %c0_i32_0 : i32, i32
  }
  func.func @transform_3(%arg0: i32) -> (i32, i32) {
    %c0_i32 = arith.constant 0 : i32
    %c0_i32_0 = arith.constant 0 : i32
    %c0_i32_1 = arith.constant 0 : i32
    return %c0_i32, %c0_i32_0 : i32, i32
  }
  func.func @transform_4(%arg0: i32) -> (i32, i32) {
    %c0_i32 = arith.constant 0 : i32
    %c0_i32_0 = arith.constant 0 : i32
    %c0_i32_1 = arith.constant 0 : i32
    return %c0_i32, %c0_i32_0 : i32, i32
  }
}

</mosaic_0001>

<bundles_post_ra>
// kernel: tpu_custom_call.1
= control target key start
LH: loop header
LB: loop body
LE: loop exit
PB: predicated region body
PF: predicated region fallthrough
CT: control target
= control target key end

     0   :  { %10 = vsyncpa [#allocation3], 0  ;;  %s475_s0 = inlined_call_operand.hbm [shape: f32[32,128], index: 0, kind: input, shape index: {}]   ;;  %s476_s1 = inlined_call_operand.vmem [shape: f32[1,32], index: 1, kind: input, shape index: {}]   ;;  %s477_s2 = inlined_call_operand.hbm [shape: f32[1,32], index: 2, kind: output, shape index: {0}]   ;;  %s478_s3 = inlined_call_operand.hbm [shape: f32[1,128], index: 3, kind: output, shape index: {1}]   ;;  %s479_s4 = inlined_call_operand.hbm [shape: f32[1,1], index: 4, kind: output, shape index: {2}]  }
   0x1   :  { %11 = vsyncpa [#allocation4], 0 }
   0x2   :  { %12 = vsyncpa [#allocation7], 0  ;;  %s424_s15 = smov [#allocation2]  }
   0x3   :  { %s18_s16 = sshll.u32 %s424_s15, 4  ;;  %s19_s16 = int_to_ptr.vmem [resolvable:$true] %s18_s16 }
   0x4   :  { %s346_s17 = scalar_lea.vmem %s19_s16, 512  ;;  %p351_p1 = scmp.lt.s32.totalorder %s19_s16, %s19_s16 }
   0x5   :  { %p347_p0 = scmp.ne.s32.totalorder %s19_s16, %s346_s17  ;;  %p352_p2 = scmp.lt.s32.totalorder %s346_s17, %s346_s17 }
   0x7   :  { %p353_p3 = por %p352_p2, %p351_p1 }
   0x9   :  { %p354_p4 = pnand %p353_p3, %p347_p0 }
   0xb   :  { %357 = shalt.err (!%p354_p4)
}
   0xc   :  { %s425_s18 = smov 128   ;;  %s426_s19 = smov 8  }
   0xd   :  { %24 = dma.hbm_to_vmem [thread:$0]  %s475_s0, 512, %s19_s16, [#allocation3], %s425_s18, %s425_s18, %s426_s19  }
   0xe   :  { %418 = dma.done.wait [#allocation3], 512  }
   0xf   :  { %419 = vsyncadd [#allocation3], 4294966784  ;;  %v427_v0 = vmov 0.0   ;;  %vm428_vm0 = vmmov 0   ;;  %v33_v1 = vld [vmem:[#allocation2 + $0x18] sm:$0xff]  ;;  %v32_v2 = vld [vmem:[#allocation2 + $0x10] sm:$0xff] }
  0x10   :  { %294 = vmatprep.subr.mxu0 %v427_v0  ;;  %302 = vmatprep.mubr.msk.f32.mxu0 %vm428_vm0, %v427_v0  ;;  %v31_v3 = vld [vmem:[#allocation2 + $0x8] sm:$0xff]  ;;  %v30_v4 = vld [vmem:[#allocation2] sm:$0xff]  ;;  %vm35_vm1 = vcmask 261120   ;;  %vm110_vm2 = vcmask 1040384   ;;  %vm203_vm5 = vcmask 253952   ;;  %s429_s24 = smov [#allocation6]  }
  0x11   :  { %305 = vmatprep.subr.mxu1 %v427_v0  ;;  %313 = vmatprep.mubr.msk.f32.mxu1 %vm428_vm0, %v427_v0  ;;  %v34_v5 = vld [vmem:[%s476_s1] sm:$0x1]  ;;  %s257_s25 = sshll.u32 %s429_s24, 4  ;;  %s430_s26 = smov [#allocation5]   ;;  %s258_s25 = int_to_ptr.vmem [resolvable:$true] %s257_s25 }
  0x12   :  { %295 = vmatpush3.msra.mxu0 %v33_v1  ;;  %306 = vmatpush3.xpose.msra.mxu1 %v33_v1  ;;  %s247_s27 = sshll.u32 %s430_s26, 4  ;;  %s358_s28 = scalar_lea.vmem %s258_s25, 16  ;;  %s248_s27 = int_to_ptr.vmem [resolvable:$true] %s247_s27 }
  0x13   :  { %296 = vmatprep.subr.mxu0 %v427_v0  ;;  %307 = vmatprep.subr.mxu1 %v427_v0  ;;  %p359_p5 = scmp.ne.s32.totalorder %s258_s25, %s358_s28  ;;  %s362_s29 = scalar_lea.vmem %s258_s25, 32 }
  0x14   :  { %297 = vmatpush3.msra.mxu0 %v32_v2  ;;  %p363_p6 = scmp.lt.s32.totalorder %s258_s25, %s258_s25  ;;  %p364_p7 = scmp.lt.s32.totalorder %s362_s29, %s358_s28 }
  0x15   :  { %298 = vmatprep.subr.mxu0 %v427_v0 }
  0x16   :  { %299 = vmatpush3.msra.mxu0 %v31_v3  ;;  %308 = vmatpush3.xpose.msra.mxu1 %v32_v2  ;;  %p365_p8 = por %p364_p7, %p363_p6 }
  0x17   :  { %300 = vmatprep.subr.mxu0 %v427_v0  ;;  %309 = vmatprep.subr.mxu1 %v427_v0 }
  0x18   :  { %301 = vmatpush3.msra.mxu0 %v30_v4  ;;  %p366_p9 = pnand %p365_p8, %p359_p5 }
  0x19   :  { %303 = vmatmul.mubr.msk.f32.vlgmr.msra.gmra.mxu0 %vm35_vm1, %v34_v5 }
  0x1a   :  { %310 = vmatpush3.xpose.msra.mxu1 %v31_v3 }
  0x1b   :  { %311 = vmatprep.subr.mxu1 %v427_v0 }
  0x1e   :  { %312 = vmatpush3.xpose.msra.mxu1 %v30_v4 }
  0xd9   :  { %v105_v6 = vpop.f32.mrf.mxu0 }
  0xda   :  { %v109_v7 = vmul.f32 %v105_v6, %v105_v6 }
  0xdb   :  { %v304_v8 = vpop.f32.mrf.mxu0 }
  0xdc   :  { %v111_v9 = vsel %vm110_vm2, %v109_v7, 0.0 }
  0xdd   :  { %112 = vadd.xlane.f32.xlu0 %v111_v9 }
 0x166   :  { %v113_v10 = vpop.xlane.xlu0 %112 }
 0x167   :  { %v114_v11 = vrot.slane %v113_v10, 4 }
 0x169   :  { %v115_v12 = vadd.f32 %v114_v11, %v113_v10 }
 0x16b   :  { %v116_v13 = vrot.slane %v115_v12, 2 }
 0x16d   :  { %v117_v14 = vadd.f32 %v116_v13, %v115_v12 }
 0x16f   :  { %v118_v15 = vrot.slane %v117_v14, 1 }
 0x171   :  { %v119_v16 = vadd.f32 %v118_v15, %v117_v14 }
 0x173   :  { %316 = vpush %v119_v16 }
 0x1a4   :  { %s317_s1 = spop %316 }
 0x1a5   :  { %v121_v17 = vstv %s317_s1 }
 0x1a6   :  { %330 = vrsqrt.f32 %v121_v17  ;;  %vm124_vm3 = vcmp.eq.f32.partialorder %v121_v17, inf  ;;  %v127_v20 = vand.u32 2147483648, %v121_v17  ;;  %vm126_vm4 = vcmp.eq.f32.partialorder %v121_v17, 0.0 }
 0x1b3   :  { %v331_v18 = vpop.eup %330 }
 0x1b4   :  { %v123_v19 = vmul.f32 %v331_v18, %v121_v17 }
 0x1b6   :  { %v125_v21 = vsel %vm124_vm3, %v121_v17, %v123_v19 }
 0x1b7   :  { %v128_v22 = vsel %vm126_vm4, %v127_v20, %v125_v21 }
 0x1b8   :  { %v129_v23 = vadd.f32 1e-12, %v128_v22 }
 0x1ba   :  { %332 = vrcp.f32 %v129_v23 }
 0x1c7   :  { %v333_v24 = vpop.eup %332 }
 0x1c8   :  { %v131_v25 = vmul.f32 %v333_v24, %v105_v6 }
 0x1ca   :  { %314 = vmatmul.mubr.f32.vlgmr.msra.gmra.mxu1 %v131_v25  ;;  %240 = vst [vmem:[#allocation6] sm:$0x1] %v131_v25 }
 0x28a   :  { %v198_v26 = vpop.f32.mrf.mxu1 }
 0x28b   :  { %v202_v27 = vmul.f32 %v198_v26, %v198_v26 }
 0x28c   :  { %v315_v28 = vpop.f32.mrf.mxu1 }
 0x28d   :  { %v204_v29 = vsel %vm203_vm5, %v202_v27, 0.0 }
 0x28e   :  { %205 = vadd.xlane.f32.xlu0 %v204_v29 }
 0x317   :  { %v206_v30 = vpop.xlane.xlu0 %205 }
 0x318   :  { %v207_v31 = vrot.slane %v206_v30, 4 }
 0x31a   :  { %v208_v32 = vadd.f32 %v207_v31, %v206_v30 }
 0x31c   :  { %v209_v33 = vrot.slane %v208_v32, 2 }
 0x31e   :  { %v210_v34 = vadd.f32 %v209_v33, %v208_v32 }
 0x320   :  { %v211_v35 = vrot.slane %v210_v34, 1 }
 0x322   :  { %v212_v36 = vadd.f32 %v211_v35, %v210_v34 }
 0x324   :  { %318 = vpush %v212_v36 }
 0x355   :  { %s319_s23 = spop %318 }
 0x356   :  { %v214_v37 = vstv %s319_s23 }
 0x357   :  { %334 = vrsqrt.f32 %v214_v37  ;;  %vm217_vm6 = vcmp.eq.f32.partialorder %v214_v37, inf  ;;  %v220_v40 = vand.u32 2147483648, %v214_v37  ;;  %vm219_vm7 = vcmp.eq.f32.partialorder %v214_v37, 0.0 }
 0x364   :  { %v335_v38 = vpop.eup %334 }
 0x365   :  { %v216_v39 = vmul.f32 %v335_v38, %v214_v37 }
 0x367   :  { %v218_v41 = vsel %vm217_vm6, %v214_v37, %v216_v39 }
 0x368   :  { %v221_v42 = vsel %vm219_vm7, %v220_v40, %v218_v41 }
 0x369   :  { %v222_v43 = vadd.f32 1e-12, %v221_v42 }
 0x36b   :  { %336 = vrcp.f32 %v222_v43 }
 0x378   :  { %v337_v44 = vpop.eup %336 }
 0x379   :  { %v224_v45 = vmul.f32 %v337_v44, %v198_v26 }
 0x37b   :  { %v225_v46 = vmul.f32 %v224_v45, %v198_v26  ;;  %239 = vst.msk [vmem:[#allocation5] sm:$0x1] %vm203_vm5, %v224_v45 }
 0x37d   :  { %v226_v47 = vsel %vm203_vm5, %v225_v46, 0.0 }
 0x37e   :  { %227 = vadd.xlane.f32.xlu1 %v226_v47 }
 0x37f   :  { %369 = shalt.err (!%p366_p9)
}
 0x380   :  { %260 = dma.vmem_to_hbm [thread:$0]  %s258_s25, 16, %s478_s3, [#allocation7]  }
 0x381   :  { %s378_s6 = scalar_lea.vmem %s248_s27, 16  ;;  %s382_s7 = scalar_lea.vmem %s248_s27, 32 }
 0x382   :  { %p379_p10 = scmp.ne.s32.totalorder %s248_s27, %s378_s6  ;;  %p383_p11 = scmp.lt.s32.totalorder %s248_s27, %s248_s27 }
 0x383   :  { %p384_p12 = scmp.lt.s32.totalorder %s382_s7, %s378_s6 }
 0x385   :  { %p385_p13 = por %p384_p12, %p383_p11 }
 0x387   :  { %p386_p0 = pnand %p385_p13, %p379_p10 }
 0x389   :  { %389 = shalt.err (!%p386_p0)
}
 0x38a   :  { %250 = dma.vmem_to_hbm [thread:$0]  %s248_s27, 16, %s477_s2, [#allocation4]   ;;  %vm237_vm8 = vcmask 0  }
 0x38b   :  { %s431_s3 = smov [#allocation8]  }
 0x38c   :  { %s267_s10 = sshll.u32 %s431_s3, 4  ;;  %s268_s10 = int_to_ptr.vmem [resolvable:$true] %s267_s10 }
 0x38d   :  { %s398_s12 = scalar_lea.vmem %s268_s10, 16  ;;  %s402_s13 = scalar_lea.vmem %s268_s10, 32 }
 0x38e   :  { %p399_p1 = scmp.ne.s32.totalorder %s268_s10, %s398_s12  ;;  %p403_p2 = scmp.lt.s32.totalorder %s268_s10, %s268_s10 }
 0x38f   :  { %p404_p3 = scmp.lt.s32.totalorder %s402_s13, %s398_s12 }
 0x391   :  { %p405_p4 = por %p404_p3, %p403_p2 }
 0x393   :  { %p406_p5 = pnand %p405_p4, %p399_p1 }
 0x407   :  { %v228_v48 = vpop.xlane.xlu1 %227 }
 0x408   :  { %v229_v49 = vrot.slane %v228_v48, 4 }
 0x40a   :  { %v230_v50 = vadd.f32 %v229_v49, %v228_v48 }
 0x40c   :  { %v231_v51 = vrot.slane %v230_v50, 2 }
 0x40e   :  { %v232_v52 = vadd.f32 %v231_v51, %v230_v50 }
 0x410   :  { %v233_v53 = vrot.slane %v232_v52, 1 }
 0x412   :  { %v234_v54 = vadd.f32 %v233_v53, %v232_v52 }
 0x414   :  { %320 = vpush %v234_v54 }
 0x445   :  { %s321_s11 = spop %320 }
 0x446   :  { %v236_v55 = vstv %s321_s11 }
 0x447   :  { %238 = vst.msk [vmem:[#allocation8] sm:$0x1] %vm237_vm8, %v236_v55 }
 0x448   :  { %409 = shalt.err (!%p406_p5)
}
 0x449   :  { %270 = dma.vmem_to_hbm [thread:$0]  %s268_s10, 16, %s479_s4, [#allocation7]  }
 0x44a   :  { %420 = dma.done.wait [#allocation4], 16  }
 0x44b   :  { %421 = vsyncadd [#allocation4], 4294967280 }
 0x44c   :  { %422 = dma.done.wait [#allocation7], 32  }
 0x44d   :  { %423 = vsyncadd [#allocation7], 4294967264 }
 0x44e   :  { %280 = vsyncpa [#allocation3], 1 }
 0x44f   :  { %281 = vsyncpa [#allocation4], 1 }
 0x450   :  { %282 = vsyncpa [#allocation7], 1 }

</bundles_post_ra>
